<compile_context>
chip_gen: v7x
topology: tpu7x:2x2x1
jax: 0.10.0
libtpu: 0.0.40
codegen_flags: <defaults>
</compile_context>

<pallas_src>
import functools
import math

import jax
import jax.numpy as jnp
from jax import lax
from jax.experimental import pallas as pl
from jax.experimental.pallas import tpu as pltpu


def _mha_fused_kernel(x_ref, wqkv_ref, wfc_ref, o_ref, *, batch, seq,
                      n_heads, dim_attn):
    # x_ref:    (B*S, Dv)                      batch folded into M
    # wqkv_ref: (Dv, H*(2*Da+Dv))              per-head-contiguous [Wq|Wk|Wv]
    # wfc_ref:  (Dv, H*Dv)                     head-major-permuted, lane-dense
    # o_ref:    (B*S, Dv)
    B, S, H, Da = batch, seq, n_heads, dim_attn
    x = x_ref[...]                                            # (B*S, Dv) f32
    Dv = x.shape[1]
    per_head = 2 * Da + Dv
    inv_sqrt_da = 1.0 / math.sqrt(Da)

    # One lane-dense projection matmul for ALL batches and heads.
    qkv = lax.dot_general(
        x, wqkv_ref[...],
        dimension_numbers=(((1,), (0,)), ((), ())),
        preferred_element_type=jnp.float32)                   # (B*S, H*per_head)

    rows = []
    for b in range(B):                         # static, unrolled (tiny B)
        r0 = b * S
        head_outs = []
        for h in range(H):                     # static, unrolled over heads
            base = h * per_head
            q_h = qkv[r0:r0 + S, base:base + Da]                    # (S, Da)
            k_h = qkv[r0:r0 + S, base + Da:base + 2 * Da]           # (S, Da)
            v_h = qkv[r0:r0 + S, base + 2 * Da:base + per_head]     # (S, Dv)

            # scores: contract last dim of both operands (no explicit K^T)
            s = lax.dot_general(
                q_h, k_h,
                dimension_numbers=(((1,), (1,)), ((), ())),
                preferred_element_type=jnp.float32) * inv_sqrt_da   # (S, S)

            # numerically-stable softmax, normalization deferred past PV matmul
            s = s - jnp.max(s, axis=-1, keepdims=True)
            e = jnp.exp(s)
            inv = pl.reciprocal(jnp.sum(e, axis=-1, keepdims=True))  # exact
            pv = jnp.dot(e, v_h, preferred_element_type=jnp.float32)  # (S, Dv)
            head_outs.append(pv * inv)

        rows.append(jnp.concatenate(head_outs, axis=-1))      # (S, H*Dv)

    a = jnp.concatenate(rows, axis=0)                         # (B*S, H*Dv)

    # fused mixing Linear: contract a's last dim with wfc's last dim (trans_b)
    out = lax.dot_general(
        a, wfc_ref[...],
        dimension_numbers=(((1,), (1,)), ((), ())),
        preferred_element_type=jnp.float32)                   # (B*S, Dv)
    o_ref[...] = out.astype(o_ref.dtype)


def multi_head_attention_block(x, wq, wk, wv, wfc):
    """x: (B, S, Dv); wq/wk: (H, Da, Dv); wv: (H, Dv, Dv); wfc: (Dv, H*Dv).

    Self-attention path only (PyTorch forward with kv=None).
    """
    B, S, Dv = x.shape
    H, Da, _ = wq.shape
    per_head = 2 * Da + Dv

    # ---- host-side weight packing (one-time, lane-dense) ----
    # Per-head-contiguous columns: [Wq_h.T | Wk_h.T | Wv_h.T] for h = 0..H-1,
    # so (x @ wqkv)[:, h*per_head + j] addresses head h's Q/K/V directly.
    blocks = [jnp.concatenate([wq[h].T, wk[h].T, wv[h].T], axis=1)
              for h in range(H)]
    wqkv = jnp.concatenate(blocks, axis=1)                # (Dv, H*(2*Da+Dv))

    # Permute fc columns from torch's stack(dim=-1).flatten order (f = d*H + h)
    # to head-major order (g = h*Dv + d).  Kept lane-dense as (Dv, H*Dv); the
    # kernel contracts last-vs-last (equivalent to a @ wfc_perm.T).
    wfc_perm = jnp.transpose(wfc.reshape(Dv, Dv, H), (0, 2, 1)).reshape(Dv, H * Dv)

    x2 = x.reshape(B * S, Dv)                             # free, contiguous view

    kernel = functools.partial(_mha_fused_kernel, batch=B, seq=S,
                               n_heads=H, dim_attn=Da)

    out = pl.pallas_call(
        kernel,
        out_shape=jax.ShapeDtypeStruct((B * S, Dv), jnp.float32),
        grid=(1,),
        in_specs=[
            pl.BlockSpec((B * S, Dv), lambda i: (0, 0)),
            pl.BlockSpec((Dv, H * per_head), lambda i: (0, 0)),
            pl.BlockSpec((Dv, H * Dv), lambda i: (0, 0)),
        ],
        out_specs=pl.BlockSpec((B * S, Dv), lambda i: (0, 0)),
        compiler_params=pltpu.CompilerParams(
            dimension_semantics=("arbitrary",)),
    )(x2, wqkv, wfc_perm)

    return out.reshape(B, S, Dv)


def _ref_forward(x, wq, wk, wv, wfc):
    """Pure-JAX reference mirroring the PyTorch module, for verification."""
    outs = []
    for h in range(wq.shape[0]):
        q = x @ wq[h].T
        k = x @ wk[h].T
        v = x @ wv[h].T
        s = (q @ jnp.swapaxes(k, -1, -2)) / jnp.sqrt(jnp.float32(q.shape[-1]))
        p = jax.nn.softmax(s, axis=-1)
        outs.append(p @ v)
    a = jnp.stack(outs, axis=-1)                     # (B, S, Dv, H)
    a = a.reshape(a.shape[0], a.shape[1], -1)        # (B, S, Dv*H), flat = d*H + h
    return a @ wfc.T


if __name__ == "__main__":
    # small, module-consistent shapes
    B, S = 2, 8
    dim_val, dim_attn, n_heads = 32, 16, 4

    key = jax.random.PRNGKey(0)
    kx, kq, kk, kv, kf = jax.random.split(key, 5)

    x = jax.random.normal(kx, (B, S, dim_val), dtype=jnp.float32)

    # deterministic, Linear-like init (uniform +/- 1/sqrt(fan_in)), bias=False
    def uinit(k, shape, fan_in):
        bound = 1.0 / math.sqrt(fan_in)
        return jax.random.uniform(k, shape, jnp.float32, -bound, bound)

    wq = uinit(kq, (n_heads, dim_attn, dim_val), dim_val)
    wk = uinit(kk, (n_heads, dim_attn, dim_val), dim_val)
    wv = uinit(kv, (n_heads, dim_val, dim_val), dim_val)
    wfc = uinit(kf, (dim_val, n_heads * dim_val), n_heads * dim_val)

    out = jax.block_until_ready(multi_head_attention_block(x, wq, wk, wv, wfc))

    ref = _ref_forward(x, wq, wk, wv, wfc)
    assert out.shape == (B, S, dim_val)
    assert jnp.allclose(out, ref, atol=1e-4, rtol=1e-4), "mismatch vs reference"

    print("KERNEL_OK")
</pallas_src>

<mosaic_0001>
module attributes {stable_mosaic.version = 11 : i64} {
  func.func @_mha_fused_kernel(%arg0: i32, %arg1: memref<16x32xf32, #tpu.memory_space<vmem>>, %arg2: memref<32x256xf32, #tpu.memory_space<vmem>>, %arg3: memref<32x128xf32, #tpu.memory_space<vmem>>, %arg4: memref<16x32xf32, #tpu.memory_space<vmem>>) attributes {dimension_semantics = [#tpu.dimension_semantics<arbitrary>], iteration_bounds = array<i64: 1>, scalar_prefetch = 0 : i64, scratch_operands = 0 : i64, tpu.core_type = #tpu.core_type<tc>, window_params = [{pipeline_mode = #tpu.pipeline_mode<synchronous>, transform_indices = @transform_0, window_bounds = array<i64: 16, 32>}, {pipeline_mode = #tpu.pipeline_mode<synchronous>, transform_indices = @transform_1, window_bounds = array<i64: 32, 256>}, {pipeline_mode = #tpu.pipeline_mode<synchronous>, transform_indices = @transform_2, window_bounds = array<i64: 32, 128>}, {pipeline_mode = #tpu.pipeline_mode<synchronous>, transform_indices = @transform_3, window_bounds = array<i64: 16, 32>}]} {
    %c0 = arith.constant 0 : index
    %c0_0 = arith.constant 0 : index
    %0 = vector.load %arg1[%c0, %c0_0] : memref<16x32xf32, #tpu.memory_space<vmem>>, vector<16x32xf32>
    %c0_1 = arith.constant 0 : index
    %c0_2 = arith.constant 0 : index
    %1 = vector.load %arg2[%c0_1, %c0_2] : memref<32x256xf32, #tpu.memory_space<vmem>>, vector<32x256xf32>
    %cst = arith.constant dense<0.000000e+00> : vector<16x256xf32>
    %2 = tpu.matmul %0, %1, %cst {dimension_numbers = #tpu.dot_dimension_numbers<[1], [0], [0], [1], [0, 0, 1, 1], [], []>} : vector<16x32xf32>, vector<32x256xf32>, vector<16x256xf32> -> vector<16x256xf32>
    %3 = vector.extract_strided_slice %2 {offsets = [0, 0], sizes = [8, 16], strides = [1, 1]} : vector<16x256xf32> to vector<8x16xf32>
    %4 = vector.extract_strided_slice %2 {offsets = [0, 16], sizes = [8, 16], strides = [1, 1]} : vector<16x256xf32> to vector<8x16xf32>
    %5 = vector.extract_strided_slice %2 {offsets = [0, 32], sizes = [8, 32], strides = [1, 1]} : vector<16x256xf32> to vector<8x32xf32>
    %cst_3 = arith.constant dense<0.000000e+00> : vector<8x8xf32>
    %6 = tpu.matmul %3, %4, %cst_3 {dimension_numbers = #tpu.dot_dimension_numbers<[1], [1], [0], [0], [0, 0, 1, 0], [], []>} : vector<8x16xf32>, vector<8x16xf32>, vector<8x8xf32> -> vector<8x8xf32>
    %cst_4 = arith.constant 2.500000e-01 : f32
    %7 = vector.broadcast %cst_4 : f32 to vector<8x8xf32>
    %8 = arith.mulf %6, %7 : vector<8x8xf32>
    %cst_5 = arith.constant dense<0xFF800000> : vector<8xf32>
    %9 = vector.multi_reduction <maximumf>, %8, %cst_5 [1] : vector<8x8xf32> to vector<8xf32>
    %10 = vector.shape_cast %9 : vector<8xf32> to vector<8x1xf32>
    %11 = vector.broadcast %10 : vector<8x1xf32> to vector<8x8xf32>
    %12 = arith.subf %8, %11 : vector<8x8xf32>
    %13 = math.exp %12 : vector<8x8xf32>
    %cst_6 = arith.constant dense<0.000000e+00> : vector<8xf32>
    %14 = vector.multi_reduction <add>, %13, %cst_6 [1] : vector<8x8xf32> to vector<8xf32>
    %15 = vector.shape_cast %14 : vector<8xf32> to vector<8x1xf32>
    %16 = tpu.reciprocal %15 : vector<8x1xf32> -> vector<8x1xf32>
    %cst_7 = arith.constant dense<0.000000e+00> : vector<8x32xf32>
    %17 = tpu.matmul %13, %5, %cst_7 {dimension_numbers = #tpu.dot_dimension_numbers<[1], [0], [0], [1], [0, 0, 1, 1], [], []>} : vector<8x8xf32>, vector<8x32xf32>, vector<8x32xf32> -> vector<8x32xf32>
    %18 = vector.broadcast %16 : vector<8x1xf32> to vector<8x32xf32>
    %19 = arith.mulf %17, %18 : vector<8x32xf32>
    %20 = vector.extract_strided_slice %2 {offsets = [0, 64], sizes = [8, 16], strides = [1, 1]} : vector<16x256xf32> to vector<8x16xf32>
    %21 = vector.extract_strided_slice %2 {offsets = [0, 80], sizes = [8, 16], strides = [1, 1]} : vector<16x256xf32> to vector<8x16xf32>
    %22 = vector.extract_strided_slice %2 {offsets = [0, 96], sizes = [8, 32], strides = [1, 1]} : vector<16x256xf32> to vector<8x32xf32>
    %cst_8 = arith.constant dense<0.000000e+00> : vector<8x8xf32>
    %23 = tpu.matmul %20, %21, %cst_8 {dimension_numbers = #tpu.dot_dimension_numbers<[1], [1], [0], [0], [0, 0, 1, 0], [], []>} : vector<8x16xf32>, vector<8x16xf32>, vector<8x8xf32> -> vector<8x8xf32>
    %cst_9 = arith.constant 2.500000e-01 : f32
    %24 = vector.broadcast %cst_9 : f32 to vector<8x8xf32>
    %25 = arith.mulf %23, %24 : vector<8x8xf32>
    %cst_10 = arith.constant dense<0xFF800000> : vector<8xf32>
    %26 = vector.multi_reduction <maximumf>, %25, %cst_10 [1] : vector<8x8xf32> to vector<8xf32>
    %27 = vector.shape_cast %26 : vector<8xf32> to vector<8x1xf32>
    %28 = vector.broadcast %27 : vector<8x1xf32> to vector<8x8xf32>
    %29 = arith.subf %25, %28 : vector<8x8xf32>
    %30 = math.exp %29 : vector<8x8xf32>
    %cst_11 = arith.constant dense<0.000000e+00> : vector<8xf32>
    %31 = vector.multi_reduction <add>, %30, %cst_11 [1] : vector<8x8xf32> to vector<8xf32>
    %32 = vector.shape_cast %31 : vector<8xf32> to vector<8x1xf32>
    %33 = tpu.reciprocal %32 : vector<8x1xf32> -> vector<8x1xf32>
    %cst_12 = arith.constant dense<0.000000e+00> : vector<8x32xf32>
    %34 = tpu.matmul %30, %22, %cst_12 {dimension_numbers = #tpu.dot_dimension_numbers<[1], [0], [0], [1], [0, 0, 1, 1], [], []>} : vector<8x8xf32>, vector<8x32xf32>, vector<8x32xf32> -> vector<8x32xf32>
    %35 = vector.broadcast %33 : vector<8x1xf32> to vector<8x32xf32>
    %36 = arith.mulf %34, %35 : vector<8x32xf32>
    %37 = vector.extract_strided_slice %2 {offsets = [0, 128], sizes = [8, 16], strides = [1, 1]} : vector<16x256xf32> to vector<8x16xf32>
    %38 = vector.extract_strided_slice %2 {offsets = [0, 144], sizes = [8, 16], strides = [1, 1]} : vector<16x256xf32> to vector<8x16xf32>
    %39 = vector.extract_strided_slice %2 {offsets = [0, 160], sizes = [8, 32], strides = [1, 1]} : vector<16x256xf32> to vector<8x32xf32>
    %cst_13 = arith.constant dense<0.000000e+00> : vector<8x8xf32>
    %40 = tpu.matmul %37, %38, %cst_13 {dimension_numbers = #tpu.dot_dimension_numbers<[1], [1], [0], [0], [0, 0, 1, 0], [], []>} : vector<8x16xf32>, vector<8x16xf32>, vector<8x8xf32> -> vector<8x8xf32>
    %cst_14 = arith.constant 2.500000e-01 : f32
    %41 = vector.broadcast %cst_14 : f32 to vector<8x8xf32>
    %42 = arith.mulf %40, %41 : vector<8x8xf32>
    %cst_15 = arith.constant dense<0xFF800000> : vector<8xf32>
    %43 = vector.multi_reduction <maximumf>, %42, %cst_15 [1] : vector<8x8xf32> to vector<8xf32>
    %44 = vector.shape_cast %43 : vector<8xf32> to vector<8x1xf32>
    %45 = vector.broadcast %44 : vector<8x1xf32> to vector<8x8xf32>
    %46 = arith.subf %42, %45 : vector<8x8xf32>
    %47 = math.exp %46 : vector<8x8xf32>
    %cst_16 = arith.constant dense<0.000000e+00> : vector<8xf32>
    %48 = vector.multi_reduction <add>, %47, %cst_16 [1] : vector<8x8xf32> to vector<8xf32>
    %49 = vector.shape_cast %48 : vector<8xf32> to vector<8x1xf32>
    %50 = tpu.reciprocal %49 : vector<8x1xf32> -> vector<8x1xf32>
    %cst_17 = arith.constant dense<0.000000e+00> : vector<8x32xf32>
    %51 = tpu.matmul %47, %39, %cst_17 {dimension_numbers = #tpu.dot_dimension_numbers<[1], [0], [0], [1], [0, 0, 1, 1], [], []>} : vector<8x8xf32>, vector<8x32xf32>, vector<8x32xf32> -> vector<8x32xf32>
    %52 = vector.broadcast %50 : vector<8x1xf32> to vector<8x32xf32>
    %53 = arith.mulf %51, %52 : vector<8x32xf32>
    %54 = vector.extract_strided_slice %2 {offsets = [0, 192], sizes = [8, 16], strides = [1, 1]} : vector<16x256xf32> to vector<8x16xf32>
    %55 = vector.extract_strided_slice %2 {offsets = [0, 208], sizes = [8, 16], strides = [1, 1]} : vector<16x256xf32> to vector<8x16xf32>
    %56 = vector.extract_strided_slice %2 {offsets = [0, 224], sizes = [8, 32], strides = [1, 1]} : vector<16x256xf32> to vector<8x32xf32>
    %cst_18 = arith.constant dense<0.000000e+00> : vector<8x8xf32>
    %57 = tpu.matmul %54, %55, %cst_18 {dimension_numbers = #tpu.dot_dimension_numbers<[1], [1], [0], [0], [0, 0, 1, 0], [], []>} : vector<8x16xf32>, vector<8x16xf32>, vector<8x8xf32> -> vector<8x8xf32>
    %cst_19 = arith.constant 2.500000e-01 : f32
    %58 = vector.broadcast %cst_19 : f32 to vector<8x8xf32>
    %59 = arith.mulf %57, %58 : vector<8x8xf32>
    %cst_20 = arith.constant dense<0xFF800000> : vector<8xf32>
    %60 = vector.multi_reduction <maximumf>, %59, %cst_20 [1] : vector<8x8xf32> to vector<8xf32>
    %61 = vector.shape_cast %60 : vector<8xf32> to vector<8x1xf32>
    %62 = vector.broadcast %61 : vector<8x1xf32> to vector<8x8xf32>
    %63 = arith.subf %59, %62 : vector<8x8xf32>
    %64 = math.exp %63 : vector<8x8xf32>
    %cst_21 = arith.constant dense<0.000000e+00> : vector<8xf32>
    %65 = vector.multi_reduction <add>, %64, %cst_21 [1] : vector<8x8xf32> to vector<8xf32>
    %66 = vector.shape_cast %65 : vector<8xf32> to vector<8x1xf32>
    %67 = tpu.reciprocal %66 : vector<8x1xf32> -> vector<8x1xf32>
    %cst_22 = arith.constant dense<0.000000e+00> : vector<8x32xf32>
    %68 = tpu.matmul %64, %56, %cst_22 {dimension_numbers = #tpu.dot_dimension_numbers<[1], [0], [0], [1], [0, 0, 1, 1], [], []>} : vector<8x8xf32>, vector<8x32xf32>, vector<8x32xf32> -> vector<8x32xf32>
    %69 = vector.broadcast %67 : vector<8x1xf32> to vector<8x32xf32>
    %70 = arith.mulf %68, %69 : vector<8x32xf32>
    %71 = tpu.concatenate %19, %36, %53, %70 in 1 : vector<8x32xf32>, vector<8x32xf32>, vector<8x32xf32>, vector<8x32xf32> -> vector<8x128xf32>
    %72 = vector.extract_strided_slice %2 {offsets = [8, 0], sizes = [8, 16], strides = [1, 1]} : vector<16x256xf32> to vector<8x16xf32>
    %73 = vector.extract_strided_slice %2 {offsets = [8, 16], sizes = [8, 16], strides = [1, 1]} : vector<16x256xf32> to vector<8x16xf32>
    %74 = vector.extract_strided_slice %2 {offsets = [8, 32], sizes = [8, 32], strides = [1, 1]} : vector<16x256xf32> to vector<8x32xf32>
    %cst_23 = arith.constant dense<0.000000e+00> : vector<8x8xf32>
    %75 = tpu.matmul %72, %73, %cst_23 {dimension_numbers = #tpu.dot_dimension_numbers<[1], [1], [0], [0], [0, 0, 1, 0], [], []>} : vector<8x16xf32>, vector<8x16xf32>, vector<8x8xf32> -> vector<8x8xf32>
    %cst_24 = arith.constant 2.500000e-01 : f32
    %76 = vector.broadcast %cst_24 : f32 to vector<8x8xf32>
    %77 = arith.mulf %75, %76 : vector<8x8xf32>
    %cst_25 = arith.constant dense<0xFF800000> : vector<8xf32>
    %78 = vector.multi_reduction <maximumf>, %77, %cst_25 [1] : vector<8x8xf32> to vector<8xf32>
    %79 = vector.shape_cast %78 : vector<8xf32> to vector<8x1xf32>
    %80 = vector.broadcast %79 : vector<8x1xf32> to vector<8x8xf32>
    %81 = arith.subf %77, %80 : vector<8x8xf32>
    %82 = math.exp %81 : vector<8x8xf32>
    %cst_26 = arith.constant dense<0.000000e+00> : vector<8xf32>
    %83 = vector.multi_reduction <add>, %82, %cst_26 [1] : vector<8x8xf32> to vector<8xf32>
    %84 = vector.shape_cast %83 : vector<8xf32> to vector<8x1xf32>
    %85 = tpu.reciprocal %84 : vector<8x1xf32> -> vector<8x1xf32>
    %cst_27 = arith.constant dense<0.000000e+00> : vector<8x32xf32>
    %86 = tpu.matmul %82, %74, %cst_27 {dimension_numbers = #tpu.dot_dimension_numbers<[1], [0], [0], [1], [0, 0, 1, 1], [], []>} : vector<8x8xf32>, vector<8x32xf32>, vector<8x32xf32> -> vector<8x32xf32>
    %87 = vector.broadcast %85 : vector<8x1xf32> to vector<8x32xf32>
    %88 = arith.mulf %86, %87 : vector<8x32xf32>
    %89 = vector.extract_strided_slice %2 {offsets = [8, 64], sizes = [8, 16], strides = [1, 1]} : vector<16x256xf32> to vector<8x16xf32>
    %90 = vector.extract_strided_slice %2 {offsets = [8, 80], sizes = [8, 16], strides = [1, 1]} : vector<16x256xf32> to vector<8x16xf32>
    %91 = vector.extract_strided_slice %2 {offsets = [8, 96], sizes = [8, 32], strides = [1, 1]} : vector<16x256xf32> to vector<8x32xf32>
    %cst_28 = arith.constant dense<0.000000e+00> : vector<8x8xf32>
    %92 = tpu.matmul %89, %90, %cst_28 {dimension_numbers = #tpu.dot_dimension_numbers<[1], [1], [0], [0], [0, 0, 1, 0], [], []>} : vector<8x16xf32>, vector<8x16xf32>, vector<8x8xf32> -> vector<8x8xf32>
    %cst_29 = arith.constant 2.500000e-01 : f32
    %93 = vector.broadcast %cst_29 : f32 to vector<8x8xf32>
    %94 = arith.mulf %92, %93 : vector<8x8xf32>
    %cst_30 = arith.constant dense<0xFF800000> : vector<8xf32>
    %95 = vector.multi_reduction <maximumf>, %94, %cst_30 [1] : vector<8x8xf32> to vector<8xf32>
    %96 = vector.shape_cast %95 : vector<8xf32> to vector<8x1xf32>
    %97 = vector.broadcast %96 : vector<8x1xf32> to vector<8x8xf32>
    %98 = arith.subf %94, %97 : vector<8x8xf32>
    %99 = math.exp %98 : vector<8x8xf32>
    %cst_31 = arith.constant dense<0.000000e+00> : vector<8xf32>
    %100 = vector.multi_reduction <add>, %99, %cst_31 [1] : vector<8x8xf32> to vector<8xf32>
    %101 = vector.shape_cast %100 : vector<8xf32> to vector<8x1xf32>
    %102 = tpu.reciprocal %101 : vector<8x1xf32> -> vector<8x1xf32>
    %cst_32 = arith.constant dense<0.000000e+00> : vector<8x32xf32>
    %103 = tpu.matmul %99, %91, %cst_32 {dimension_numbers = #tpu.dot_dimension_numbers<[1], [0], [0], [1], [0, 0, 1, 1], [], []>} : vector<8x8xf32>, vector<8x32xf32>, vector<8x32xf32> -> vector<8x32xf32>
    %104 = vector.broadcast %102 : vector<8x1xf32> to vector<8x32xf32>
    %105 = arith.mulf %103, %104 : vector<8x32xf32>
    %106 = vector.extract_strided_slice %2 {offsets = [8, 128], sizes = [8, 16], strides = [1, 1]} : vector<16x256xf32> to vector<8x16xf32>
    %107 = vector.extract_strided_slice %2 {offsets = [8, 144], sizes = [8, 16], strides = [1, 1]} : vector<16x256xf32> to vector<8x16xf32>
    %108 = vector.extract_strided_slice %2 {offsets = [8, 160], sizes = [8, 32], strides = [1, 1]} : vector<16x256xf32> to vector<8x32xf32>
    %cst_33 = arith.constant dense<0.000000e+00> : vector<8x8xf32>
    %109 = tpu.matmul %106, %107, %cst_33 {dimension_numbers = #tpu.dot_dimension_numbers<[1], [1], [0], [0], [0, 0, 1, 0], [], []>} : vector<8x16xf32>, vector<8x16xf32>, vector<8x8xf32> -> vector<8x8xf32>
    %cst_34 = arith.constant 2.500000e-01 : f32
    %110 = vector.broadcast %cst_34 : f32 to vector<8x8xf32>
    %111 = arith.mulf %109, %110 : vector<8x8xf32>
    %cst_35 = arith.constant dense<0xFF800000> : vector<8xf32>
    %112 = vector.multi_reduction <maximumf>, %111, %cst_35 [1] : vector<8x8xf32> to vector<8xf32>
    %113 = vector.shape_cast %112 : vector<8xf32> to vector<8x1xf32>
    %114 = vector.broadcast %113 : vector<8x1xf32> to vector<8x8xf32>
    %115 = arith.subf %111, %114 : vector<8x8xf32>
    %116 = math.exp %115 : vector<8x8xf32>
    %cst_36 = arith.constant dense<0.000000e+00> : vector<8xf32>
    %117 = vector.multi_reduction <add>, %116, %cst_36 [1] : vector<8x8xf32> to vector<8xf32>
    %118 = vector.shape_cast %117 : vector<8xf32> to vector<8x1xf32>
    %119 = tpu.reciprocal %118 : vector<8x1xf32> -> vector<8x1xf32>
    %cst_37 = arith.constant dense<0.000000e+00> : vector<8x32xf32>
    %120 = tpu.matmul %116, %108, %cst_37 {dimension_numbers = #tpu.dot_dimension_numbers<[1], [0], [0], [1], [0, 0, 1, 1], [], []>} : vector<8x8xf32>, vector<8x32xf32>, vector<8x32xf32> -> vector<8x32xf32>
    %121 = vector.broadcast %119 : vector<8x1xf32> to vector<8x32xf32>
    %122 = arith.mulf %120, %121 : vector<8x32xf32>
    %123 = vector.extract_strided_slice %2 {offsets = [8, 192], sizes = [8, 16], strides = [1, 1]} : vector<16x256xf32> to vector<8x16xf32>
    %124 = vector.extract_strided_slice %2 {offsets = [8, 208], sizes = [8, 16], strides = [1, 1]} : vector<16x256xf32> to vector<8x16xf32>
    %125 = vector.extract_strided_slice %2 {offsets = [8, 224], sizes = [8, 32], strides = [1, 1]} : vector<16x256xf32> to vector<8x32xf32>
    %cst_38 = arith.constant dense<0.000000e+00> : vector<8x8xf32>
    %126 = tpu.matmul %123, %124, %cst_38 {dimension_numbers = #tpu.dot_dimension_numbers<[1], [1], [0], [0], [0, 0, 1, 0], [], []>} : vector<8x16xf32>, vector<8x16xf32>, vector<8x8xf32> -> vector<8x8xf32>
    %cst_39 = arith.constant 2.500000e-01 : f32
    %127 = vector.broadcast %cst_39 : f32 to vector<8x8xf32>
    %128 = arith.mulf %126, %127 : vector<8x8xf32>
    %cst_40 = arith.constant dense<0xFF800000> : vector<8xf32>
    %129 = vector.multi_reduction <maximumf>, %128, %cst_40 [1] : vector<8x8xf32> to vector<8xf32>
    %130 = vector.shape_cast %129 : vector<8xf32> to vector<8x1xf32>
    %131 = vector.broadcast %130 : vector<8x1xf32> to vector<8x8xf32>
    %132 = arith.subf %128, %131 : vector<8x8xf32>
    %133 = math.exp %132 : vector<8x8xf32>
    %cst_41 = arith.constant dense<0.000000e+00> : vector<8xf32>
    %134 = vector.multi_reduction <add>, %133, %cst_41 [1] : vector<8x8xf32> to vector<8xf32>
    %135 = vector.shape_cast %134 : vector<8xf32> to vector<8x1xf32>
    %136 = tpu.reciprocal %135 : vector<8x1xf32> -> vector<8x1xf32>
    %cst_42 = arith.constant dense<0.000000e+00> : vector<8x32xf32>
    %137 = tpu.matmul %133, %125, %cst_42 {dimension_numbers = #tpu.dot_dimension_numbers<[1], [0], [0], [1], [0, 0, 1, 1], [], []>} : vector<8x8xf32>, vector<8x32xf32>, vector<8x32xf32> -> vector<8x32xf32>
    %138 = vector.broadcast %136 : vector<8x1xf32> to vector<8x32xf32>
    %139 = arith.mulf %137, %138 : vector<8x32xf32>
    %140 = tpu.concatenate %88, %105, %122, %139 in 1 : vector<8x32xf32>, vector<8x32xf32>, vector<8x32xf32>, vector<8x32xf32> -> vector<8x128xf32>
    %141 = tpu.concatenate %71, %140 in 0 : vector<8x128xf32>, vector<8x128xf32> -> vector<16x128xf32>
    %c0_43 = arith.constant 0 : index
    %c0_44 = arith.constant 0 : index
    %142 = vector.load %arg3[%c0_43, %c0_44] : memref<32x128xf32, #tpu.memory_space<vmem>>, vector<32x128xf32>
    %cst_45 = arith.constant dense<0.000000e+00> : vector<16x32xf32>
    %143 = tpu.matmul %141, %142, %cst_45 {dimension_numbers = #tpu.dot_dimension_numbers<[1], [1], [0], [0], [0, 0, 1, 0], [], []>} : vector<16x128xf32>, vector<32x128xf32>, vector<16x32xf32> -> vector<16x32xf32>
    %c0_46 = arith.constant 0 : index
    %c0_47 = arith.constant 0 : index
    %144 = vector.load %arg4[%c0_46, %c0_47] : memref<16x32xf32, #tpu.memory_space<vmem>>, vector<16x32xf32>
    tpu.vector_store %arg4[%c0_46, %c0_47], %143 {strides = array<i32>} : memref<16x32xf32, #tpu.memory_space<vmem>>, vector<16x32xf32>,
    return
  }
  func.func @transform_0(%arg0: i32) -> (i32, i32) {
    %c0_i32 = arith.constant 0 : i32
    %c0_i32_0 = arith.constant 0 : i32
    %c0_i32_1 = arith.constant 0 : i32
    return %c0_i32, %c0_i32_0 : i32, i32
  }
  func.func @transform_1(%arg0: i32) -> (i32, i32) {
    %c0_i32 = arith.constant 0 : i32
    %c0_i32_0 = arith.constant 0 : i32
    %c0_i32_1 = arith.constant 0 : i32
    return %c0_i32, %c0_i32_0 : i32, i32
  }
  func.func @transform_2(%arg0: i32) -> (i32, i32) {
    %c0_i32 = arith.constant 0 : i32
    %c0_i32_0 = arith.constant 0 : i32
    %c0_i32_1 = arith.constant 0 : i32
    return %c0_i32, %c0_i32_0 : i32, i32
  }
  func.func @transform_3(%arg0: i32) -> (i32, i32) {
    %c0_i32 = arith.constant 0 : i32
    %c0_i32_0 = arith.constant 0 : i32
    %c0_i32_1 = arith.constant 0 : i32
    return %c0_i32, %c0_i32_0 : i32, i32
  }
}

</mosaic_0001>

<bundles_post_ra>
// kernel: tpu_custom_call.1
= control target key start
LH: loop header
LB: loop body
LE: loop exit
PB: predicated region body
PF: predicated region fallthrough
CT: control target
= control target key end

     0   :  { %8 = vsyncpa [#allocation3], 0  ;;  %s2172_s0 = inlined_call_operand.hbm [shape: f32[16,32], index: 0, kind: input, shape index: {}]   ;;  %s2173_s1 = inlined_call_operand.hbm [shape: f32[32,256], index: 1, kind: input, shape index: {}]   ;;  %s2174_s2 = inlined_call_operand.hbm [shape: f32[32,128], index: 2, kind: input, shape index: {}]   ;;  %s2175_s3 = inlined_call_operand.hbm [shape: f32[16,32], index: 3, kind: output, shape index: {}]  }
   0x1   :  { %9 = vsyncpa [#allocation6], 0 }
   0x2   :  { %10 = vsyncpa [#allocation4], 0  ;;  %s1934_s12 = smov [#allocation5]   ;;  %s1840_s16 = scalar_lea.hbm %s2173_s1, 1024 }
   0x3   :  { %s28_s13 = sshll.u32 %s1934_s12, 4  ;;  %p1841_p0 = scmp.ne.s32.totalorder %s2173_s1, %s1840_s16  ;;  %s29_s13 = int_to_ptr.vmem [resolvable:$true] %s28_s13 }
   0x4   :  { %p1844_p1 = scmp.lt.u32.totalorder %s1840_s16, %s2173_s1 }
   0x6   :  { %p1846_p2 = pnand %p1844_p1, %p1841_p0 }
   0x8   :  { %1849 = shalt.err (!%p1846_p2)
}
   0x9   :  { %s1850_s21 = scalar_lea.vmem %s29_s13, 1024  ;;  %p1855_p4 = scmp.lt.s32.totalorder %s29_s13, %s29_s13 }
   0xa   :  { %p1851_p3 = scmp.ne.s32.totalorder %s29_s13, %s1850_s21  ;;  %p1856_p5 = scmp.lt.s32.totalorder %s1850_s21, %s1850_s21 }
   0xc   :  { %p1857_p6 = por %p1856_p5, %p1855_p4 }
   0xe   :  { %p1858_p7 = pnand %p1857_p6, %p1851_p3 }
  0x10   :  { %1861 = shalt.err (!%p1858_p7)
}
  0x11   :  { %s1935_s22 = smov 256   ;;  %s1936_s23 = smov 16  }
  0x12   :  { %34 = dma.hbm_to_vmem [thread:$0]  %s2173_s1, 1024, %s29_s13, [#allocation6], %s1935_s22, %s1935_s22, %s1936_s23  }
  0x13   :  { %s1937_s26 = smov [#allocation2]   ;;  %s1862_s30 = scalar_lea.hbm %s2172_s0, 256 }
  0x14   :  { %s16_s27 = sshll.u32 %s1937_s26, 4  ;;  %p1863_p8 = scmp.ne.s32.totalorder %s2172_s0, %s1862_s30  ;;  %s17_s27 = int_to_ptr.vmem [resolvable:$true] %s16_s27 }
  0x15   :  { %p1866_p9 = scmp.lt.u32.totalorder %s1862_s30, %s2172_s0 }
  0x17   :  { %p1868_p10 = pnand %p1866_p9, %p1863_p8 }
  0x19   :  { %1871 = shalt.err (!%p1868_p10)
}
  0x1a   :  { %s1872_s8 = scalar_lea.vmem %s17_s27, 256  ;;  %p1877_p12 = scmp.lt.s32.totalorder %s17_s27, %s17_s27 }
  0x1b   :  { %p1873_p11 = scmp.ne.s32.totalorder %s17_s27, %s1872_s8  ;;  %p1878_p13 = scmp.lt.s32.totalorder %s1872_s8, %s1872_s8 }
  0x1d   :  { %p1879_p0 = por %p1878_p13, %p1877_p12 }
  0x1f   :  { %p1880_p1 = pnand %p1879_p0, %p1873_p11 }
  0x21   :  { %1883 = shalt.err (!%p1880_p1)
}
  0x22   :  { %s1938_s1 = smov 128   ;;  %s1939_s9 = smov 8  }
  0x23   :  { %22 = dma.hbm_to_vmem [thread:$0]  %s2172_s0, 256, %s17_s27, [#allocation3], %s1938_s1, %s1938_s1, %s1939_s9  }
  0x24   :  { %s1940_s12 = smov [#allocation7]   ;;  %s1884_s16 = scalar_lea.hbm %s2174_s2, 512 }
  0x25   :  { %s40_s13 = sshll.u32 %s1940_s12, 4  ;;  %p1885_p2 = scmp.ne.s32.totalorder %s2174_s2, %s1884_s16  ;;  %s41_s13 = int_to_ptr.vmem [resolvable:$true] %s40_s13 }
  0x26   :  { %p1888_p3 = scmp.lt.u32.totalorder %s1884_s16, %s2174_s2 }
  0x28   :  { %p1890_p4 = pnand %p1888_p3, %p1885_p2 }
  0x2a   :  { %1893 = shalt.err (!%p1890_p4)
}
  0x2b   :  { %s1894_s21 = scalar_lea.vmem %s41_s13, 512  ;;  %p1899_p6 = scmp.lt.s32.totalorder %s41_s13, %s41_s13 }
  0x2c   :  { %p1895_p5 = scmp.ne.s32.totalorder %s41_s13, %s1894_s21  ;;  %p1900_p7 = scmp.lt.s32.totalorder %s1894_s21, %s1894_s21 }
  0x2e   :  { %p1901_p8 = por %p1900_p7, %p1899_p6 }
  0x30   :  { %p1902_p9 = pnand %p1901_p8, %p1895_p5 }
  0x32   :  { %1905 = shalt.err (!%p1902_p9)
}
  0x33   :  { %46 = dma.hbm_to_vmem [thread:$0]  %s2174_s2, 512, %s41_s13, [#allocation6], %s1938_s1, %s1938_s1, %s1939_s9  }
  0x34   :  { %1928 = dma.done.wait [#allocation3], 256  }
  0x35   :  { %1929 = vsyncadd [#allocation3], 4294967040 }
  0x36   :  { %1930 = dma.done.wait [#allocation6], 1536  }
  0x37   :  { %1931 = vsyncadd [#allocation6], 4294965760  ;;  %v1941_v0 = vmov 0.0   ;;  %v59_v1 = vld [vmem:[#allocation5 + $0x8] sm:$0xff]  ;;  %v61_v2 = vld [vmem:[#allocation5 + $0x18] sm:$0xff]  ;;  %vm66_vm0 = vcmask 261120  }
  0x38   :  { %137 = vmatprep.mubr.f32.mxu0 %v1941_v0  ;;  %1676 = vmatprep.subr.mxu1 %v1941_v0  ;;  %v58_v3 = vld [vmem:[#allocation5] sm:$0xff]  ;;  %v1762_v4 = vpack.c.bf16 %v61_v2, %v59_v1  ;;  %v60_v5 = vld [vmem:[#allocation5 + $0x10] sm:$0xff]  ;;  %v63_v6 = vld [vmem:[#allocation5 + $0x28] sm:$0xff]  ;;  %vm1942_vm1 = vmmov 0   ;;  %s1943_s2 = smov 96   ;;  %s1944_s23 = smov 112  }
  0x39   :  { %v65_v7 = vld [vmem:[#allocation5 + $0x38] sm:$0xff]  ;;  %v1764_v8 = vpack.c.bf16 %v60_v5, %v58_v3  ;;  %v62_v10 = vld [vmem:[#allocation5 + $0x20] sm:$0xff]  ;;  %v64_v11 = vld [vmem:[#allocation5 + $0x30] sm:$0xff]  ;;  %1678 = vmatprep.mubr.msk.f32.mxu1 %vm1942_vm1, %v1941_v0  ;;  %s1945_s24 = smov 48   ;;  %s1946_s25 = smov 64   ;;  %vm153_vm2 = vcmask 130048  }
  0x3a   :  { %v1766_v9 = vpack.c.bf16 %v65_v7, %v63_v6  ;;  %1763 = vmatprep.subr.bf16.mxu0 %v1762_v4  ;;  %v1768_v12 = vpack.c.bf16 %v64_v11, %v62_v10  ;;  %v56_v13 = vld [vmem:[#allocation2] sm:$0xff]  ;;  %v57_v14 = vld [vmem:[#allocation2 + $0x8] sm:$0xff]  ;;  %s1947_s26 = smov 32   ;;  %vm229_vm3 = vcmask 64512   ;;  %vm827_vm4 = vcmask 523264   ;;  %s1948_s27 = smov [#allocation8]  }
  0x3b   :  { %1765 = vmatpush1.bf16.msra.mxu0 %v1764_v8  ;;  %vm829_vm5 = vcmask 785408   ;;  %s1594_s28 = sshll.u32 %s1948_s27, 4  ;;  %s1595_s28 = int_to_ptr.vmem [resolvable:$true] %s1594_s28 }
  0x3c   :  { %1767 = vmatprep.subr.bf16.mxu0 %v1766_v9  ;;  %s1906_s29 = scalar_lea.vmem %s1595_s28, 256  ;;  %p1911_p11 = scmp.lt.s32.totalorder %s1595_s28, %s1595_s28 }
  0x3d   :  { %p1907_p10 = scmp.ne.s32.totalorder %s1595_s28, %s1906_s29  ;;  %p1912_p12 = scmp.lt.s32.totalorder %s1906_s29, %s1906_s29 }
  0x3f   :  { %1769 = vmatpush1.bf16.msra.mxu0 %v1768_v12  ;;  %p1913_p13 = por %p1912_p12, %p1911_p11 }
  0x40   :  { %1671 = vmatprep.subr.mxu0 %v1941_v0 }
  0x41   :  { %p1914_p0 = pnand %p1913_p13, %p1907_p10 }
  0x42   :  { %1607 = vmatmul.mubr.msk.f32.vlgmr.msra.gmra.mrb[0].mxu0 %vm66_vm0, %v56_v13 }
  0x43   :  { %143 = vmatprep.mubr.f32.mxu0 %v1941_v0 }
  0x46   :  { %1608 = vmatmul.mubr.msk.f32.gmra.mrb[2].mxu0 %vm66_vm0, %v57_v14 }
  0x47   :  { %1673 = vmatprep.mubr.msk.f32.mxu0 %vm1942_vm1, %v1941_v0 }
 0x115   :  { %v139_v15 = vpop.f32.mrb[0].mxu0 }
 0x116   :  { %240 = vrot.lane.b32.xlu1 %v139_v15, %s1943_s2  ;;  %151 = vrot.lane.b32.xlu0 %v139_v15, %s1944_s23  ;;  %v2023_v16 = vpop.f32.mrb[1].mxu0 }
 0x119   :  { %v2025_v17 = vpop.f32.mrb[2].mxu0 }
 0x11a   :  { %319 = vrot.lane.b32.xlu1 %v139_v15, %s1945_s24  ;;  %v2027_v18 = vpop.f32.mrb[3].mxu0 }
 0x11e   :  { %317 = vrot.lane.b32.xlu1 %v139_v15, %s1946_s25 }
 0x122   :  { %484 = vrot.lane.b32.xlu1 %v2023_v16, %s1944_s23 }
 0x126   :  { %650 = vrot.lane.b32.xlu1 %v2023_v16, %s1945_s24 }
 0x12a   :  { %648 = vrot.lane.b32.xlu1 %v2023_v16, %s1946_s25 }
 0x12e   :  { %832 = vrot.lane.b32.xlu1 %v2025_v17, %s1944_s23 }
 0x132   :  { %998 = vrot.lane.b32.xlu1 %v2025_v17, %s1945_s24 }
 0x136   :  { %996 = vrot.lane.b32.xlu1 %v2025_v17, %s1946_s25 }
 0x13a   :  { %1329 = vrot.lane.b32.xlu1 %v2027_v18, %s1945_s24 }
 0x13e   :  { %1327 = vrot.lane.b32.xlu1 %v2027_v18, %s1946_s25 }
 0x142   :  { %406 = vrot.lane.b32.xlu1 %v139_v15, %s1947_s26 }
 0x188   :  { %v241_v19 = vpop.permute.xlu1 %240  ;;  %v152_v20 = vpop.permute.xlu0 %151 }
 0x189   :  { %1672 = vmatpush3.xpose.msk.msra.mxu0 %vm153_vm2, %v152_v20  ;;  %1677 = vmatpush3.msra.mxu1 %v241_v19 }
 0x18a   :  { %1686 = vmatprep.subr.mxu0 %v1941_v0  ;;  %1681 = vmatprep.subr.mxu1 %v1941_v0 }
 0x18c   :  { %v320_v21 = vpop.permute.xlu1 %319  ;;  %1674 = vmatmul.mubr.msk.f32.vlgmr.msra.gmra.mrb[4].mxu0 %vm153_vm2, %v139_v15 }
 0x18d   :  { %1688 = vmatprep.mubr.msk.f32.mxu0 %vm1942_vm1, %v1941_v0 }
 0x190   :  { %v318_v22 = vpop.permute.xlu1 %317 }
 0x194   :  { %v485_v23 = vpop.permute.xlu1 %484 }
 0x198   :  { %v651_v24 = vpop.permute.xlu1 %650 }
 0x19c   :  { %v649_v25 = vpop.permute.xlu1 %648 }
 0x1a0   :  { %v833_v26 = vpop.permute.xlu1 %832 }
 0x1a4   :  { %v999_v27 = vpop.permute.xlu1 %998 }
 0x1a8   :  { %v997_v28 = vpop.permute.xlu1 %996 }
 0x1ac   :  { %v1330_v29 = vpop.permute.xlu1 %1329 }
 0x1b0   :  { %v1328_v30 = vpop.permute.xlu1 %1327 }
 0x1b4   :  { %v407_v31 = vpop.permute.xlu1 %406 }
 0x1b5   :  { %1687 = vmatpush3.msra.mxu0 %v407_v31 }
 0x1b6   :  { %1696 = vmatprep.subr.mxu0 %v1941_v0 }
 0x25f   :  { %v224_v32 = vpop.f32.mrb[4].mxu0 }
 0x260   :  { %v228_v33 = vmul.f32 0.25, %v224_v32  ;;  %v1675_v34 = vpop.f32.mrb[5].mxu0 }
 0x262   :  { %v230_v35 = vsel %vm229_vm3, %v228_v33, -inf }
 0x263   :  { %231 = vmax.xlane.f32.xlu0 %v230_v35 }
 0x279   :  { %1163 = vrot.lane.b32.xlu0 %v2027_v18, %s1944_s23 }
 0x2f0   :  { %v232_v36 = vpop.xlane.xlu0 %231 }
 0x2f1   :  { %v233_v37 = vsub.f32 %v228_v33, %v232_v36 }
 0x2f3   :  { %v234_v38 = vmul.f32 1.442695, %v233_v37 }
 0x2f4   :  { %v1164_v40 = vpop.permute.xlu0 %1163 }
 0x2f5   :  { %1808 = vpow2.f32 %v234_v38 }
 0x2ff   :  { %v2054_v39 = vpop.eup %1808 }
 0x300   :  { %1679 = vmatmul.mubr.msk.f32.vlgmr.msra.gmra.mrb[0].mxu1 %vm229_vm3, %v2054_v39 }
 0x301   :  { %1682 = vmatpush3.xpose.msk.msra.mxu1 %vm153_vm2, %v320_v21  ;;  %1683 = vmatprep.mubr.msk.f32.mxu1 %vm1942_vm1, %v1941_v0 }
 0x302   :  { %1691 = vmatprep.subr.mxu1 %v1941_v0 }
 0x304   :  { %1684 = vmatmul.mubr.msk.f32.vlgmr.msra.gmra.mrb[2].mxu1 %vm153_vm2, %v318_v22 }
 0x305   :  { %1692 = vmatpush3.xpose.msk.msra.mxu1 %vm153_vm2, %v485_v23  ;;  %1693 = vmatprep.mubr.msk.f32.mxu1 %vm1942_vm1, %v1941_v0 }
 0x306   :  { %1701 = vmatprep.subr.mxu1 %v1941_v0 }
 0x308   :  { %1694 = vmatmul.mubr.msk.f32.vlgmr.msra.gmra.mrb[4].mxu1 %vm153_vm2, %v2023_v16 }
 0x309   :  { %1702 = vmatpush3.xpose.msk.msra.mxu1 %vm153_vm2, %v651_v24  ;;  %1703 = vmatprep.mubr.msk.f32.mxu1 %vm1942_vm1, %v1941_v0 }
 0x30a   :  { %1711 = vmatprep.subr.mxu1 %v1941_v0 }
 0x30c   :  { %1704 = vmatmul.mubr.msk.f32.vlgmr.msra.gmra.mrb[6].mxu1 %vm153_vm2, %v649_v25 }
 0x30d   :  { %1712 = vmatpush3.xpose.msk.msra.mxu1 %vm153_vm2, %v833_v26  ;;  %1713 = vmatprep.mubr.msk.f32.mxu1 %vm1942_vm1, %v1941_v0 }
 0x30e   :  { %1721 = vmatprep.subr.mxu1 %v1941_v0 }
 0x310   :  { %1714 = vmatmul.mubr.msk.f32.vlgmr.msra.gmra.mrb[8].mxu1 %vm153_vm2, %v2025_v17 }
 0x311   :  { %1722 = vmatpush3.xpose.msk.msra.mxu1 %vm153_vm2, %v999_v27  ;;  %1723 = vmatprep.mubr.msk.f32.mxu1 %vm1942_vm1, %v1941_v0 }
 0x312   :  { %1731 = vmatprep.subr.mxu1 %v1941_v0 }
 0x314   :  { %1724 = vmatmul.mubr.msk.f32.vlgmr.msra.gmra.mrb[10].mxu1 %vm153_vm2, %v997_v28 }
 0x315   :  { %1732 = vmatpush3.xpose.msk.msra.mxu1 %vm153_vm2, %v1164_v40  ;;  %1733 = vmatprep.mubr.msk.f32.mxu1 %vm1942_vm1, %v1941_v0 }
 0x316   :  { %1741 = vmatprep.subr.mxu1 %v1941_v0 }
 0x318   :  { %1734 = vmatmul.mubr.msk.f32.vlgmr.msra.gmra.mrb[12].mxu1 %vm153_vm2, %v2027_v18 }
 0x319   :  { %1742 = vmatpush3.xpose.msk.msra.mxu1 %vm153_vm2, %v1330_v29  ;;  %1743 = vmatprep.mubr.msk.f32.mxu1 %vm1942_vm1, %v1941_v0 }
 0x31c   :  { %1744 = vmatmul.mubr.msk.f32.vlgmr.msra.gmra.mrb[14].mxu1 %vm153_vm2, %v1328_v30 }
 0x3d3   :  { %v2095_v41 = vpop.f32.mrb[0].mxu1 }
 0x3d4   :  { %v1680_v42 = vpop.f32.mrb[1].mxu1 }
 0x3d7   :  { %v391_v43 = vpop.f32.mrb[2].mxu1 }
 0x3d8   :  { %v395_v44 = vmul.f32 0.25, %v391_v43  ;;  %v1685_v45 = vpop.f32.mrb[3].mxu1 }
 0x3da   :  { %v396_v46 = vsel %vm229_vm3, %v395_v44, -inf }
 0x3db   :  { %397 = vmax.xlane.f32.xlu1 %v396_v46  ;;  %v556_v47 = vpop.f32.mrb[4].mxu1 }
 0x3dc   :  { %v560_v48 = vmul.f32 0.25, %v556_v47  ;;  %v1695_v49 = vpop.f32.mrb[5].mxu1 }
 0x3de   :  { %v561_v50 = vsel %vm229_vm3, %v560_v48, -inf }
 0x3df   :  { %562 = vmax.xlane.f32.xlu0 %v561_v50  ;;  %v722_v51 = vpop.f32.mrb[6].mxu1 }
 0x3e0   :  { %v1705_v52 = vpop.f32.mrb[7].mxu1  ;;  %v726_v62 = vmul.f32 0.25, %v722_v51  ;;  %v236_v51 = vsel %vm229_vm3, %v2054_v39, 0.0 }
 0x3e1   :  { %v1508_v52 = vld [vmem:[#allocation7] sm:$0xff] }
 0x3e2   :  { %v727_v3 = vsel %vm229_vm3, %v726_v62, -inf }
 0x3e3   :  { %v904_v53 = vpop.f32.mrb[8].mxu1 }
 0x3e4   :  { %v1715_v54 = vpop.f32.mrb[9].mxu1  ;;  %v908_v2 = vmul.f32 0.25, %v904_v53  ;;  %v1509_v53 = vld [vmem:[#allocation7 + $0x8] sm:$0xff] }
 0x3e5   :  { %v1770_v54 = vpack.c.bf16 %v1509_v53, %v1508_v52 }
 0x3e6   :  { %v909_v6 = vsel %vm229_vm3, %v908_v2, -inf }
 0x3e7   :  { %v1070_v55 = vpop.f32.mrb[10].mxu1  ;;  %1771 = vmatprep.subr.bf16.mxu1 %v1770_v54 }
 0x3e8   :  { %v1725_v56 = vpop.f32.mrb[11].mxu1  ;;  %v1074_v61 = vmul.f32 0.25, %v1070_v55  ;;  %1773 = vmatpush3.bf16.xpose.msra.mxu1 %v1770_v54 }
 0x3ea   :  { %v1075_v1 = vsel %vm229_vm3, %v1074_v61, -inf }
 0x3eb   :  { %v1235_v57 = vpop.f32.mrb[12].mxu1 }
 0x3ec   :  { %737 = vrot.lane.b32.xlu1 %v2023_v16, %s1947_s26  ;;  %v1735_v58 = vpop.f32.mrb[13].mxu1  ;;  %v1239_v5 = vmul.f32 0.25, %v1235_v57 }
 0x3ee   :  { %v1240_v7 = vsel %vm229_vm3, %v1239_v5, -inf }
 0x3ef   :  { %v1401_v59 = vpop.f32.mrb[14].mxu1 }
 0x3f0   :  { %919 = vrot.lane.b32.xlu1 %v2025_v17, %s1943_s2  ;;  %v1745_v60 = vpop.f32.mrb[15].mxu1  ;;  %v1405_v63 = vmul.f32 0.25, %v1401_v59 }
 0x3f2   :  { %v1406_v4 = vsel %vm229_vm3, %v1405_v63, -inf }
 0x3f4   :  { %1085 = vrot.lane.b32.xlu1 %v2025_v17, %s1947_s26 }
 0x3f5   :  { %571 = vrot.lane.b32.xlu0 %v2023_v16, %s1943_s2 }
 0x414   :  { %1076 = vmax.xlane.f32.xlu0 %v1075_v1  ;;  %v1510_v1 = vld [vmem:[#allocation7 + $0x10] sm:$0xff] }
 0x418   :  { %728 = vmax.xlane.f32.xlu1 %v727_v3  ;;  %1407 = vmax.xlane.f32.xlu0 %v1406_v4 }
 0x41c   :  { %910 = vmax.xlane.f32.xlu1 %v909_v6 }
 0x420   :  { %1241 = vmax.xlane.f32.xlu1 %v1240_v7 }
 0x42e   :  { %1250 = vrot.lane.b32.xlu0 %v2027_v18, %s1943_s2 }
 0x431   :  { %1416 = vrot.lane.b32.xlu1 %v2027_v18, %s1947_s26 }
 0x468   :  { %v398_v8 = vpop.xlane.xlu1 %397 }
 0x469   :  { %v399_v9 = vsub.f32 %v395_v44, %v398_v8 }
 0x46b   :  { %v400_v10 = vmul.f32 1.442695, %v399_v9 }
 0x46c   :  { %v563_v11 = vpop.xlane.xlu0 %562  ;;  %v738_v18 = vpop.permute.xlu1 %737 }
 0x46d   :  { %1810 = vpow2.f32 %v400_v10  ;;  %v564_v12 = vsub.f32 %v560_v48, %v563_v11 }
 0x46f   :  { %v565_v13 = vmul.f32 1.442695, %v564_v12 }
 0x470   :  { %v572_v15 = vpop.permute.xlu0 %571  ;;  %v920_v20 = vpop.permute.xlu1 %919 }
 0x471   :  { %1812 = vpow2.f32 %v565_v13 }
 0x474   :  { %v1086_v21 = vpop.permute.xlu1 %1085 }
 0x477   :  { %v1811_v14 = vpop.eup %1810 }
 0x478   :  { %1689 = vmatmul.mubr.msk.f32.vlgmr.msra.gmra.mrb[6].mxu0 %vm229_vm3, %v1811_v14  ;;  %v402_v16 = vsel %vm229_vm3, %v1811_v14, 0.0 }
 0x479   :  { %1697 = vmatpush3.msra.mxu0 %v572_v15  ;;  %403 = vadd.xlane.f32.xlu0 %v402_v16 }
 0x47a   :  { %1698 = vmatprep.mubr.msk.f32.mxu0 %vm1942_vm1, %v1941_v0  ;;  %1706 = vmatprep.subr.mxu0 %v1941_v0 }
 0x47b   :  { %v1813_v17 = vpop.eup %1812 }
 0x47c   :  { %1699 = vmatmul.mubr.msk.f32.vlgmr.msra.gmra.mrb[8].mxu0 %vm229_vm3, %v1813_v17  ;;  %v567_v19 = vsel %vm229_vm3, %v1813_v17, 0.0 }
 0x47d   :  { %1707 = vmatpush3.msra.mxu0 %v738_v18  ;;  %568 = vadd.xlane.f32.xlu1 %v567_v19 }
 0x47e   :  { %1708 = vmatprep.mubr.msk.f32.mxu0 %vm1942_vm1, %v1941_v0  ;;  %1716 = vmatprep.subr.mxu0 %v1941_v0 }
 0x4a1   :  { %v1077_v22 = vpop.xlane.xlu0 %1076 }
 0x4a2   :  { %v1078_v23 = vsub.f32 %v1074_v61, %v1077_v22 }
 0x4a4   :  { %v1079_v28 = vmul.f32 1.442695, %v1078_v23 }
 0x4a5   :  { %v729_v24 = vpop.xlane.xlu1 %728  ;;  %v1408_v25 = vpop.xlane.xlu0 %1407 }
 0x4a6   :  { %v730_v26 = vsub.f32 %v726_v62, %v729_v24  ;;  %v1409_v27 = vsub.f32 %v1405_v63, %v1408_v25 }
 0x4a8   :  { %v731_v29 = vmul.f32 1.442695, %v730_v26  ;;  %v1410_v30 = vmul.f32 1.442695, %v1409_v27 }
 0x4a9   :  { %v911_v31 = vpop.xlane.xlu1 %910  ;;  %v1251_v48 = vpop.permute.xlu0 %1250 }
 0x4aa   :  { %1814 = vpow2.f32 %v731_v29  ;;  %v912_v32 = vsub.f32 %v908_v2, %v911_v31  ;;  %v1511_v2 = vld [vmem:[#allocation7 + $0x18] sm:$0xff] }
 0x4ab   :  { %1816 = vpow2.f32 %v1410_v30  ;;  %v1774_v4 = vpack.c.bf16 %v1511_v2, %v1510_v1 }
 0x4ac   :  { %1818 = vpow2.f32 %v1079_v28  ;;  %v913_v33 = vmul.f32 1.442695, %v912_v32 }
 0x4ad   :  { %v1242_v34 = vpop.xlane.xlu1 %1241  ;;  %1775 = vmatprep.subr.bf16.mxu1 %v1774_v4 }
 0x4ae   :  { %1820 = vpow2.f32 %v913_v33  ;;  %v1243_v35 = vsub.f32 %v1239_v5, %v1242_v34  ;;  %1777 = vmatpush3.bf16.xpose.msra.mxu1 %v1774_v4 }
 0x4b0   :  { %v1244_v36 = vmul.f32 1.442695, %v1243_v35 }
 0x4b1   :  { %v1417_v50 = vpop.permute.xlu1 %1416 }
 0x4b2   :  { %1822 = vpow2.f32 %v1244_v36 }
 0x4b4   :  { %v1815_v37 = vpop.eup %1814 }
 0x4b5   :  { %v1817_v38 = vpop.eup %1816  ;;  %1709 = vmatmul.mubr.msk.f32.vlgmr.msra.gmra.mrb[10].mxu0 %vm229_vm3, %v1815_v37  ;;  %v733_v40 = vsel %vm229_vm3, %v1815_v37, 0.0 }
 0x4b6   :  { %v1819_v42 = vpop.eup %1818  ;;  %1717 = vmatpush3.msra.mxu0 %v920_v20  ;;  %734 = vadd.xlane.f32.xlu0 %v733_v40  ;;  %v1412_v43 = vsel %vm229_vm3, %v1817_v38, 0.0 }
 0x4b7   :  { %1413 = vadd.xlane.f32.xlu1 %v1412_v43  ;;  %1718 = vmatprep.mubr.msk.f32.mxu0 %vm1942_vm1, %v1941_v0  ;;  %v1081_v45 = vsel %vm229_vm3, %v1819_v42, 0.0 }
 0x4b8   :  { %v1821_v44 = vpop.eup %1820  ;;  %1726 = vmatprep.subr.mxu0 %v1941_v0 }
 0x4b9   :  { %1719 = vmatmul.mubr.msk.f32.vlgmr.msra.gmra.mrb[12].mxu0 %vm229_vm3, %v1821_v44  ;;  %v915_v46 = vsel %vm229_vm3, %v1821_v44, 0.0 }
 0x4ba   :  { %1727 = vmatpush3.msra.mxu0 %v1086_v21  ;;  %1082 = vadd.xlane.f32.xlu0 %v1081_v45 }
 0x4bb   :  { %916 = vadd.xlane.f32.xlu1 %v915_v46  ;;  %1728 = vmatprep.mubr.msk.f32.mxu0 %vm1942_vm1, %v1941_v0 }
 0x4bc   :  { %v1823_v47 = vpop.eup %1822  ;;  %1736 = vmatprep.subr.mxu0 %v1941_v0 }
 0x4bd   :  { %1729 = vmatmul.mubr.msk.f32.vlgmr.msra.gmra.mrb[14].mxu0 %vm229_vm3, %v1819_v42  ;;  %v1246_v49 = vsel %vm229_vm3, %v1823_v47, 0.0 }
 0x4be   :  { %1737 = vmatpush3.msra.mxu0 %v1251_v48  ;;  %1247 = vadd.xlane.f32.xlu0 %v1246_v49 }
 0x4bf   :  { %1738 = vmatprep.mubr.msk.f32.mxu0 %vm1942_vm1, %v1941_v0  ;;  %1746 = vmatprep.subr.mxu0 %v1941_v0 }
 0x4c1   :  { %1739 = vmatmul.mubr.msk.f32.vlgmr.msra.gmra.mrb[16].mxu0 %vm229_vm3, %v1823_v47 }
 0x4c2   :  { %1747 = vmatpush3.msra.mxu0 %v1417_v50  ;;  %237 = vadd.xlane.f32.xlu0 %v236_v51 }
 0x4c3   :  { %1748 = vmatprep.mubr.msk.f32.mxu0 %vm1942_vm1, %v1941_v0 }
 0x4c5   :  { %1749 = vmatmul.mubr.msk.f32.vlgmr.msra.gmra.mrb[18].mxu0 %vm229_vm3, %v1817_v38 }
 0x506   :  { %v404_v59 = vpop.xlane.xlu0 %403 }
 0x507   :  { %1824 = vrcp.f32 %v404_v59 }
 0x50a   :  { %v569_v39 = vpop.xlane.xlu1 %568 }
 0x511   :  { %v1825_v7 = vpop.eup %1824 }
 0x543   :  { %v735_v60 = vpop.xlane.xlu0 %734 }
 0x544   :  { %v1414_v3 = vpop.xlane.xlu1 %1413 }
 0x547   :  { %v1083_v61 = vpop.xlane.xlu0 %1082 }
 0x548   :  { %1826 = vrcp.f32 %v1083_v61  ;;  %v917_v29 = vpop.xlane.xlu1 %916 }
 0x549   :  { %1828 = vrcp.f32 %v569_v39 }
 0x54b   :  { %v478_v55 = vpop.f32.mrb[6].mxu0  ;;  %v1248_v62 = vpop.xlane.xlu0 %1247 }
 0x54c   :  { %v1690_v56 = vpop.f32.mrb[7].mxu0  ;;  %1830 = vrcp.f32 %v1248_v62  ;;  %v482_v10 = vmul.f32 %v1825_v7, %v478_v55 }
 0x54d   :  { %1832 = vrcp.f32 %v735_v60 }
 0x54e   :  { %1834 = vrcp.f32 %v1414_v3 }
 0x54f   :  { %v643_v57 = vpop.f32.mrb[8].mxu0  ;;  %v238_v28 = vpop.xlane.xlu0 %237 }
 0x550   :  { %v1700_v58 = vpop.f32.mrb[9].mxu0  ;;  %1836 = vrcp.f32 %v238_v28 }
 0x551   :  { %1838 = vrcp.f32 %v917_v29 }
 0x552   :  { %v1827_v8 = vpop.eup %1826 }
 0x553   :  { %v1829_v13 = vpop.eup %1828 }
 0x554   :  { %v647_v17 = vmul.f32 %v1829_v13, %v643_v57 }
 0x556   :  { %v1831_v15 = vpop.eup %1830 }
 0x557   :  { %v1833_v20 = vpop.eup %1832 }
 0x558   :  { %v1835_v22 = vpop.eup %1834 }
 0x55a   :  { %v1837_v31 = vpop.eup %1836 }
 0x55b   :  { %v1839_v35 = vpop.eup %1838  ;;  %v316_v40 = vmul.f32 %v1837_v31, %v2095_v41 }
 0x588   :  { %v809_v63 = vpop.f32.mrb[10].mxu0 }
 0x589   :  { %v1710_v0 = vpop.f32.mrb[11].mxu0  ;;  %v813_v24 = vmul.f32 %v1833_v20, %v809_v63 }
 0x58c   :  { %v991_v5 = vpop.f32.mrb[12].mxu0 }
 0x58d   :  { %v1720_v6 = vpop.f32.mrb[13].mxu0  ;;  %v995_v38 = vmul.f32 %v1839_v35, %v991_v5 }
 0x590   :  { %v1157_v9 = vpop.f32.mrb[14].mxu0 }
 0x591   :  { %v1161_v11 = vmul.f32 %v1827_v8, %v1157_v9  ;;  %v1730_v12 = vpop.f32.mrb[15].mxu0 }
 0x593   :  { %v1793_v14 = vpack.i.bf16 %v1161_v11, %v482_v10 }
 0x594   :  { %v1322_v16 = vpop.f32.mrb[16].mxu0 }
 0x595   :  { %v1326_v18 = vmul.f32 %v1831_v15, %v1322_v16  ;;  %1794 = vrot.lane.b32.xlu0 %v1793_v14, %s1947_s26  ;;  %v1740_v19 = vpop.f32.mrb[17].mxu0 }
 0x597   :  { %v1798_v21 = vpack.i.bf16 %v1326_v18, %v647_v17 }
 0x598   :  { %v1488_v23 = vpop.f32.mrb[18].mxu0 }
 0x599   :  { %v1492_v25 = vmul.f32 %v1835_v22, %v1488_v23  ;;  %1799 = vrot.lane.b32.xlu1 %v1798_v21, %s1946_s25  ;;  %v1750_v26 = vpop.f32.mrb[19].mxu0 }
 0x59b   :  { %v1803_v27 = vpack.i.bf16 %v1492_v25, %v813_v24 }
 0x59d   :  { %1804 = vrot.lane.b32.xlu1 %v1803_v27, %s1943_s2 }
 0x607   :  { %v1795_v30 = vpop.permute.xlu0 %1794 }
 0x608   :  { %v1797_v33 = vunpack.i.h.bf16 %v1795_v30  ;;  %v1796_v34 = vunpack.i.l.bf16 %v1795_v30 }
 0x60a   :  { %v1505_v43 = vsel %vm66_vm0, %v995_v38, %v1797_v33  ;;  %v826_v44 = vsel %vm66_vm0, %v316_v40, %v1796_v34 }
 0x60b   :  { %v1800_v32 = vpop.permute.xlu1 %1799 }
 0x60c   :  { %v1802_v36 = vunpack.i.h.bf16 %v1800_v32  ;;  %v1801_v37 = vunpack.i.l.bf16 %v1800_v32 }
 0x60e   :  { %v828_v47 = vsel %vm827_vm4, %v826_v44, %v1801_v37  ;;  %v1506_v48 = vsel %vm827_vm4, %v1505_v43, %v1802_v36 }
 0x60f   :  { %v1805_v42 = vpop.permute.xlu1 %1804 }
 0x610   :  { %v1807_v45 = vunpack.i.h.bf16 %v1805_v42  ;;  %v1806_v46 = vunpack.i.l.bf16 %v1805_v42 }
 0x612   :  { %v830_v49 = vsel %vm829_vm5, %v828_v47, %v1806_v46  ;;  %v1507_v50 = vsel %vm829_vm5, %v1506_v48, %v1807_v45 }
 0x613   :  { %1759 = vmatprep.mubr.f32.mxu1 %v830_v49 }
 0x614   :  { %1760 = vmatmul.mubr.f32.vlgmr.msra.gmra.mrb[16].mxu1 %v1507_v50 }
 0x6e7   :  { %v1761_v51 = vpop.f32.mrb[16].mxu1 }
 0x6e8   :  { %1588 = vst.msk [vmem:[#allocation8 + $0x8] sm:$0xff] %vm66_vm0, %v1761_v51  ;;  %v1578_v41 = vpop.f32.mrb[17].mxu1 }
 0x6e9   :  { %1587 = vst.msk [vmem:[#allocation8] sm:$0xff] %vm66_vm0, %v1578_v41 }
 0x6ea   :  { %1917 = shalt.err (!%p1914_p0)
}
 0x6eb   :  { %s1918_s5 = scalar_lea.hbm %s2175_s3, 256 }
 0x6ec   :  { %p1919_p1 = scmp.ne.s32.totalorder %s2175_s3, %s1918_s5  ;;  %p1922_p2 = scmp.lt.u32.totalorder %s1918_s5, %s2175_s3 }
 0x6ee   :  { %p1924_p3 = pnand %p1922_p2, %p1919_p1 }
 0x6f0   :  { %1927 = shalt.err (!%p1924_p3)
}
 0x6f1   :  { %1600 = dma.vmem_to_hbm [thread:$0]  %s1595_s28, 256, %s2175_s3, [#allocation4], %s1938_s1, %s1938_s1, %s1939_s9  }
 0x6f2   :  { %1932 = dma.done.wait [#allocation4], 256  }
 0x6f3   :  { %1933 = vsyncadd [#allocation4], 4294967040 }
 0x6f4   :  { %1604 = vsyncpa [#allocation3], 1 }
 0x6f5   :  { %1605 = vsyncpa [#allocation6], 1 }
 0x6f6   :  { %1606 = vsyncpa [#allocation4], 1 }

</bundles_post_ra>
